<compile_context>
chip_gen: v7x
topology: tpu7x:2x2x1
jax: 0.10.0
libtpu: 0.0.40
codegen_flags: <defaults>
</compile_context>

<pallas_src>
import jax
import jax.numpy as jnp
from jax import lax
from jax.experimental import pallas as pl
from jax.experimental.pallas import tpu as pltpu


# ----------------------------------------------------------------------------
# Kernel
# ----------------------------------------------------------------------------
def _patch_embed_kernel_factory(bt, use_norm, eps, pack_groups=None):
    def kernel(x_ref, w_ref, b_ref, o_ref):
        # x_ref: (Bt, C, TL)   w_ref/b_ref: (C, 1) f32
        # o_ref: (Bt, TL, C)   or (Bt, TL//G, 128) in the lane-dense variant.
        for bb in range(bt):                      # static unroll over batch block
            xb = x_ref[bb]                        # (C, TL)
            if use_norm:
                x = xb.astype(jnp.float32)
                # One-pass mean / E[x^2] over the channel (sublane) axis.
                mean = jnp.mean(x, axis=0, keepdims=True)          # (1, TL)
                mean_sq = jnp.mean(x * x, axis=0, keepdims=True)   # (1, TL)
                # Clamp: E[x^2]-E[x]^2 can go slightly negative (cancellation)
                # on non-zero-mean activations -> rsqrt would produce NaN.
                var = jnp.maximum(mean_sq - mean * mean, 0.0)
                inv = lax.rsqrt(var + eps)
                y = (x - mean) * inv * w_ref[...] + b_ref[...]     # (C, TL)
                y = y.astype(o_ref.dtype)         # narrow BEFORE the transpose
            else:
                y = xb                            # pure transpose-copy, no f32 roundtrip
            yt = y.T                              # (TL, C)
            if pack_groups is not None:
                tl, c = yt.shape                  # lane-dense (TL//G, 128) store
                yt = yt.reshape(tl // pack_groups, pack_groups * c)
            o_ref[bb] = yt
    return kernel


# ----------------------------------------------------------------------------
# Tiling / VMEM heuristics
# ----------------------------------------------------------------------------
def _vmem_capacity_bytes():
    """Per-core VMEM capacity; conservative v7x fallback (64 MiB)."""
    try:
        info = pltpu.get_tpu_info()
        cap = getattr(info, "vmem_capacity_bytes", None)
        if cap:
            return int(cap)
    except Exception:
        pass
    return 64 * 1024 * 1024


def _choose_tiles(B, C, L, in_itemsize, out_itemsize, footprint_budget,
                  max_bt=8):
    """Pick (TL, Bt): largest legal token tile under the VMEM footprint budget,
    keeping the parallel grid >= 2 steps when possible and blocking batches
    for small-L stages."""
    # Double-buffered input + output blocks plus ~6 f32 temporaries
    # (x, x*x, y, transposed copy, spill headroom), per tile element.
    bytes_per_elem = 2 * in_itemsize + 2 * out_itemsize + 6 * 4

    def fits(bt, tl):
        return bt * C * tl * bytes_per_elem <= footprint_budget

    # TL must be a multiple of 128 (lane-dense, (8,128)-legal) or equal L.
    tl_cands = sorted({L} | {t for t in range(128, L, 128) if L % t == 0},
                      reverse=True)
    tl = next((t for t in tl_cands if fits(1, t)), tl_cands[-1])
    num_lt = L // tl

    # v7x has 2 TensorCores: keep the parallel grid >= 2 steps when possible.
    if B * num_lt < 2:
        smaller = next((t for t in tl_cands if t < L and fits(1, t)), None)
        if smaller is not None:
            tl = smaller
            num_lt = L // tl
    # TODO(synk): L with no 128-multiple divisor (e.g. Swin L=3136) and B==1
    # still yields a 1-step grid; one v7x TC idles for that shape.

    # Small-L stages (e.g. Swin deep stage L=49): block batch elements per
    # step to amortize per-step overhead, keeping >=2 grid steps when B >= 2.
    bt = 1
    if num_lt == 1 and B > 1:
        bt_cap = max(1, B // 2)
        for cand in sorted((d for d in range(1, min(B, max_bt) + 1)
                            if B % d == 0), reverse=True):
            if cand <= bt_cap and fits(cand, tl):
                bt = cand
                break
    return tl, bt


# ----------------------------------------------------------------------------
# Wrapper
# ----------------------------------------------------------------------------
def patch_embed_forward(x, weight, bias, *, use_norm=True, eps=1e-5,
                        token_tile=None, batch_tile=None,
                        lane_dense_out=False):
    """x: (B, C, H, W) NCHW. Returns (B, H*W, C)."""
    B, C, H, W = x.shape
    L = H * W
    x2 = x.reshape(B, C, L)                      # free, same contiguous layout
    out_dtype = x.dtype
    itemsize = x.dtype.itemsize

    # Generation-aware VMEM limits (v7x: 64 MiB physical; v5e/v6e: 128 MiB).
    vmem_cap = _vmem_capacity_bytes()
    vmem_limit = max(32 << 20, min(int(vmem_cap * 0.75), 96 << 20))
    footprint_budget = min(int(vmem_limit * 0.8), 64 << 20)

    TL, Bt = _choose_tiles(B, C, L, itemsize, itemsize, footprint_budget)
    if token_tile is not None:
        TL = token_tile
    if batch_tile is not None:
        Bt = batch_tile
    assert L % TL == 0 and B % Bt == 0
    grid = (B // Bt, L // TL)

    # Cast / reshape params once wrapper-side; (C, 1) broadcasts over TL lanes.
    w = weight.reshape(C, 1).astype(jnp.float32)
    b = bias.reshape(C, 1).astype(jnp.float32)

    cost = pl.CostEstimate(
        flops=B * L * C * (8 if use_norm else 0),
        transcendentals=(B * L) if use_norm else 0,
        bytes_accessed=2 * B * L * C * itemsize,
    )
    in_specs = [
        pl.BlockSpec((Bt, C, TL), lambda bi, li: (bi, 0, li)),
        pl.BlockSpec((C, 1), lambda bi, li: (0, 0)),
        pl.BlockSpec((C, 1), lambda bi, li: (0, 0)),
    ]
    compiler_params = pltpu.CompilerParams(
        dimension_semantics=("parallel", "parallel"),
        vmem_limit_bytes=vmem_limit,
    )

    # Experimental lane-dense output: pack G = 128//C tokens per 128-lane row
    # so every vst is unmasked (biggest measured store lever for C < 128).
    if (lane_dense_out and C < 128 and 128 % C == 0
            and TL % (128 // C) == 0):
        G = 128 // C
        kernel = _patch_embed_kernel_factory(Bt, use_norm, eps, pack_groups=G)
        out = pl.pallas_call(
            kernel,
            out_shape=jax.ShapeDtypeStruct((B, L // G, 128), out_dtype),
            grid_spec=pltpu.PrefetchScalarGridSpec(
                num_scalar_prefetch=0, grid=grid,
                in_specs=in_specs,
                out_specs=pl.BlockSpec((Bt, TL // G, 128),
                                       lambda bi, li: (bi, li, 0))),
            compiler_params=compiler_params,
            cost_estimate=cost,
        )(x2, w, b)
        return out.reshape(B, L, C)              # contiguous -> free reshape

    kernel = _patch_embed_kernel_factory(Bt, use_norm, eps, pack_groups=None)
    return pl.pallas_call(
        kernel,
        out_shape=jax.ShapeDtypeStruct((B, L, C), out_dtype),
        grid_spec=pltpu.PrefetchScalarGridSpec(
            num_scalar_prefetch=0, grid=grid,
            in_specs=in_specs,
            out_specs=pl.BlockSpec((Bt, TL, C), lambda bi, li: (bi, li, 0))),
        compiler_params=compiler_params,
        cost_estimate=cost,
    )(x2, w, b)


# ----------------------------------------------------------------------------
# Pure-JAX reference (two-pass LayerNorm, matches PyTorch semantics)
# ----------------------------------------------------------------------------
def patch_embed_reference(x, weight, bias, *, use_norm=True, eps=1e-5):
    B, C, H, W = x.shape
    y = jnp.transpose(x.reshape(B, C, H * W), (0, 2, 1)).astype(jnp.float32)
    if use_norm:
        mean = jnp.mean(y, axis=-1, keepdims=True)
        var = jnp.mean(jnp.square(y - mean), axis=-1, keepdims=True)
        y = (y - mean) * lax.rsqrt(var + eps)
        y = y * weight.astype(jnp.float32) + bias.astype(jnp.float32)
    return y.astype(x.dtype)


if __name__ == "__main__":
    key = jax.random.PRNGKey(0)
    kx1, kx2 = jax.random.split(key)

    # Case 1: batch=2, embed_dim(C)=32, patches_resolution=8x8, LayerNorm on.
    B, C, H, W = 2, 32, 8, 8
    x = jax.random.normal(kx1, (B, C, H, W), dtype=jnp.float32) + 0.5  # non-zero mean
    weight = 1.0 + 0.01 * jnp.arange(C, dtype=jnp.float32)
    bias = 0.001 * jnp.arange(C, dtype=jnp.float32)

    out = jax.block_until_ready(patch_embed_forward(x, weight, bias, use_norm=True))
    ref = patch_embed_reference(x, weight, bias, use_norm=True)
    assert out.shape == (B, H * W, C)
    assert jnp.allclose(out, ref, atol=1e-4, rtol=1e-4)

    # Case 2: norm_layer=None (pure re-layout path, no f32 roundtrip).
    out2 = jax.block_until_ready(patch_embed_forward(x, weight, bias, use_norm=False))
    ref2 = patch_embed_reference(x, weight, bias, use_norm=False)
    assert jnp.array_equal(out2, ref2)

    # Case 3: small-L stage (L < 128) exercising the batch-blocked path (Bt>1).
    B3, C3, H3, W3 = 4, 32, 4, 4
    x3 = jax.random.normal(kx2, (B3, C3, H3, W3), dtype=jnp.float32) + 0.25
    w3 = jnp.ones((C3,), jnp.float32)
    b3 = jnp.zeros((C3,), jnp.float32)
    out3 = jax.block_until_ready(patch_embed_forward(x3, w3, b3, use_norm=True))
    ref3 = patch_embed_reference(x3, w3, b3, use_norm=True)
    assert jnp.allclose(out3, ref3, atol=1e-4, rtol=1e-4)

    # Best-effort: experimental lane-dense output path (C < 128).  Falls back
    # silently if this Mosaic build rejects the minor-dim reshape.
    try:
        out4 = jax.block_until_ready(
            patch_embed_forward(x, weight, bias, use_norm=True, lane_dense_out=True))
        assert jnp.allclose(out4, ref, atol=1e-4, rtol=1e-4)
    except Exception:
        pass

    print("KERNEL_OK")
</pallas_src>

<mosaic_0001>
module attributes {stable_mosaic.version = 11 : i64} {
  func.func @kernel(%arg0: i32, %arg1: i32, %arg2: memref<1x32x64xf32, #tpu.memory_space<vmem>>, %arg3: memref<32x1xf32, #tpu.memory_space<vmem>>, %arg4: memref<32x1xf32, #tpu.memory_space<vmem>>, %arg5: memref<1x64x32xf32, #tpu.memory_space<vmem>>) attributes {dimension_semantics = [#tpu.dimension_semantics<parallel>, #tpu.dimension_semantics<parallel>], iteration_bounds = array<i64: 2, 1>, scalar_prefetch = 0 : i64, scratch_operands = 0 : i64, tpu.core_type = #tpu.core_type<tc>, window_params = [{transform_indices = @transform_0, window_bounds = array<i64: 1, 32, 64>}, {pipeline_mode = #tpu.pipeline_mode<synchronous>, transform_indices = @transform_1, window_bounds = array<i64: 32, 1>}, {pipeline_mode = #tpu.pipeline_mode<synchronous>, transform_indices = @transform_2, window_bounds = array<i64: 32, 1>}, {transform_indices = @transform_3, window_bounds = array<i64: 1, 64, 32>}]} {
    %c0 = arith.constant 0 : index
    %c0_0 = arith.constant 0 : index
    %c0_1 = arith.constant 0 : index
    %0 = vector.load %arg2[%c0, %c0_0, %c0_1] : memref<1x32x64xf32, #tpu.memory_space<vmem>>, vector<1x32x64xf32>
    %1 = vector.shape_cast %0 : vector<1x32x64xf32> to vector<32x64xf32>
    %cst = arith.constant dense<0.000000e+00> : vector<64xf32>
    %2 = vector.multi_reduction <add>, %1, %cst [0] : vector<32x64xf32> to vector<64xf32>
    %3 = vector.shape_cast %2 : vector<64xf32> to vector<1x64xf32>
    %cst_2 = arith.constant 3.200000e+01 : f32
    %4 = vector.broadcast %cst_2 : f32 to vector<1x64xf32>
    %5 = arith.divf %3, %4 : vector<1x64xf32>
    %6 = arith.mulf %1, %1 : vector<32x64xf32>
    %cst_3 = arith.constant dense<0.000000e+00> : vector<64xf32>
    %7 = vector.multi_reduction <add>, %6, %cst_3 [0] : vector<32x64xf32> to vector<64xf32>
    %8 = vector.shape_cast %7 : vector<64xf32> to vector<1x64xf32>
    %cst_4 = arith.constant 3.200000e+01 : f32
    %9 = vector.broadcast %cst_4 : f32 to vector<1x64xf32>
    %10 = arith.divf %8, %9 : vector<1x64xf32>
    %11 = arith.mulf %5, %5 : vector<1x64xf32>
    %12 = arith.subf %10, %11 : vector<1x64xf32>
    %cst_5 = arith.constant 0.000000e+00 : f32
    %13 = vector.broadcast %cst_5 : f32 to vector<1x64xf32>
    %14 = arith.maximumf %12, %13 : vector<1x64xf32>
    %cst_6 = arith.constant 9.99999974E-6 : f32
    %15 = vector.broadcast %cst_6 : f32 to vector<1x64xf32>
    %16 = arith.addf %14, %15 : vector<1x64xf32>
    %17 = math.rsqrt %16 : vector<1x64xf32>
    %18 = vector.broadcast %5 : vector<1x64xf32> to vector<32x64xf32>
    %19 = arith.subf %1, %18 : vector<32x64xf32>
    %20 = vector.broadcast %17 : vector<1x64xf32> to vector<32x64xf32>
    %21 = arith.mulf %19, %20 : vector<32x64xf32>
    %c0_7 = arith.constant 0 : index
    %c0_8 = arith.constant 0 : index
    %22 = vector.load %arg3[%c0_7, %c0_8] : memref<32x1xf32, #tpu.memory_space<vmem>>, vector<32x1xf32>
    %23 = vector.broadcast %22 : vector<32x1xf32> to vector<32x64xf32>
    %24 = arith.mulf %21, %23 : vector<32x64xf32>
    %c0_9 = arith.constant 0 : index
    %c0_10 = arith.constant 0 : index
    %25 = vector.load %arg4[%c0_9, %c0_10] : memref<32x1xf32, #tpu.memory_space<vmem>>, vector<32x1xf32>
    %26 = vector.broadcast %25 : vector<32x1xf32> to vector<32x64xf32>
    %27 = arith.addf %24, %26 : vector<32x64xf32>
    %28 = tpu.transpose %27, [1, 0] : vector<32x64xf32> -> vector<64x32xf32>
    %c0_11 = arith.constant 0 : index
    %c0_12 = arith.constant 0 : index
    %c0_13 = arith.constant 0 : index
    %29 = vector.load %arg5[%c0_11, %c0_12, %c0_13] : memref<1x64x32xf32, #tpu.memory_space<vmem>>, vector<1x64x32xf32>
    %30 = vector.shape_cast %29 : vector<1x64x32xf32> to vector<64x32xf32>
    %31 = vector.shape_cast %28 : vector<64x32xf32> to vector<1x64x32xf32>
    tpu.vector_store %arg5[%c0_11, %c0_12, %c0_13], %31 {strides = array<i32>} : memref<1x64x32xf32, #tpu.memory_space<vmem>>, vector<1x64x32xf32>,
    return
  }
  func.func @transform_0(%arg0: i32, %arg1: i32) -> (i32, i32, i32) {
    %c0_i32 = arith.constant 0 : i32
    %c0_i32_0 = arith.constant 0 : i32
    return %arg0, %c0_i32, %arg1 : i32, i32, i32
  }
  func.func @transform_1(%arg0: i32, %arg1: i32) -> (i32, i32) {
    %c0_i32 = arith.constant 0 : i32
    %c0_i32_0 = arith.constant 0 : i32
    %c0_i32_1 = arith.constant 0 : i32
    return %c0_i32, %c0_i32_0 : i32, i32
  }
  func.func @transform_2(%arg0: i32, %arg1: i32) -> (i32, i32) {
    %c0_i32 = arith.constant 0 : i32
    %c0_i32_0 = arith.constant 0 : i32
    %c0_i32_1 = arith.constant 0 : i32
    return %c0_i32, %c0_i32_0 : i32, i32
  }
  func.func @transform_3(%arg0: i32, %arg1: i32) -> (i32, i32, i32) {
    %c0_i32 = arith.constant 0 : i32
    %c0_i32_0 = arith.constant 0 : i32
    return %arg0, %arg1, %c0_i32 : i32, i32, i32
  }
}

</mosaic_0001>

<bundles_post_ra>
// kernel: tpu_custom_call.1
= control target key start
LH: loop header
LB: loop body
LE: loop exit
PB: predicated region body
PF: predicated region fallthrough
CT: control target
= control target key end

     0   :  { %s528_s12 = smov 0   ;;  %s530_s13 = smov 0   ;;  %s609_s0 = inlined_call_operand.vmem [shape: f32[2,32,64], index: 0, kind: input, shape index: {}]   ;;  %s610_s1 = inlined_call_operand.vmem [shape: f32[32,1], index: 1, kind: input, shape index: {}]   ;;  %s611_s2 = inlined_call_operand.vmem [shape: f32[32,1], index: 2, kind: input, shape index: {}]   ;;  %s612_s3 = inlined_call_operand.vmem [shape: f32[2,64,32], index: 3, kind: output, shape index: {}]  }
   0x1   :  { %s532_s14 = smov 0  }
   0x2 LB: > { %s25_s15 = sadd.s32 1, %s501_s13  ;;  %p444_p0 = scmp.ge.s32.totalorder %s505_s14, 1  ;;  %s505_s14 = sphi %s532_s14, %s13_s14   ;;  %s501_s13 = sphi %s530_s13, %s614_s13   ;;  %s497_s12 = sphi %s528_s12, %s613_s12  }
   0x3   : > { %p27_p1 = scmp.ge.s32.totalorder %s25_s15, 2  ;;  %p156_p2 = scmp.lt.s32.totalorder %s505_s14, 3 }
   0x5   : > { %s616_s15 = smov (%p27_p1, %s25_s15), 0  ;;  %p157_p3 = pnand %p444_p0, %p156_p2 }
   0x6   : > { %v284_v0 = vld [vmem:[%s611_s2] sm:$0xff] (!%p157_p3)  ;;  %v507_v2 = vmov (!%p157_p3), 0   ;;  %v258_v3 = vld [vmem:[%s610_s1 + $0x10] sm:$0xff] (!%p157_p3)  ;;  %v257_v4 = vld [vmem:[%s610_s1 + $0x8] sm:$0xff] (!%p157_p3)  ;;  %p187_p4 = scmp.lt.s32.totalorder (!%p157_p3), %s497_s12, 1  ;;  %vm209_vm0 = vcmask (!%p157_p3), 523264  }
   0x7   : > { %160 = sbr.rel (%p157_p3) target bundleno = 300 (0x12c), region = 32  ;;  %v256_v1 = vld [vmem:[%s610_s1] sm:$0xff] (!%p157_p3)  ;;  %480 = vset.pattern.permute.xlu1 (!%p157_p3), %v507_v2  ;;  %479 = vset.pattern.permute.xlu0 (!%p157_p3), %v507_v2  ;;  %v259_v5 = vld [vmem:[%s610_s1 + $0x18] sm:$0xff] (!%p157_p3)  ;;  %v285_v6 = vld [vmem:[%s611_s2 + $0x8] sm:$0xff] (!%p157_p3)  ;;  %vm344_vm1 = vcmask (!%p157_p3), 261120  }
   0x8   : > { %290 = vperm.xlu1 (!%p157_p3), %480, %v284_v0   ;;  %262 = vperm.xlu0 (!%p157_p3), %479, %v256_v1   ;;  %v287_v7 = vld [vmem:[%s611_s2 + $0x18] sm:$0xff] (!%p157_p3)  ;;  %v286_v8 = vld [vmem:[%s611_s2 + $0x10] sm:$0xff] (!%p157_p3) }
   0xc   : > { %272 = vperm.xlu1 (!%p157_p3), %480, %v258_v3   ;;  %267 = vperm.xlu0 (!%p157_p3), %479, %v257_v4  }
   0xe   : > { %s618_s12 = smov (!%p187_p4, %s497_s12), 1 }
   0xf   : > { %s451_s5 = sshll.u32 %s618_s12, 5  ;;  %s452_s9 = sshll.u32 %s618_s12, 6 }
  0x10   : > { %277 = vperm.xlu1 %480, %v259_v5   ;;  %295 = vperm.xlu0 %479, %v285_v6   ;;  %s194_s8 = scalar_lea.vmem %s609_s0, %s451_s5  ;;  %s203_s16 = scalar_lea.vmem %s612_s3, %s452_s9 }
  0x11   : > { %v205_v9 = vld [vmem:[%s194_s8] sm:$0xff]  ;;  %v206_v10 = vld [vmem:[%s194_s8 + $0x8] sm:$0xff]  ;;  %v207_v15 = vld [vmem:[%s194_s8 + $0x10] sm:$0xff] }
  0x12   : > { %v210_v11 = vsel %vm209_vm0, %v205_v9, 0.0  ;;  %v211_v12 = vsel %vm209_vm0, %v206_v10, 0.0  ;;  %v225_v13 = vmul.f32 %v205_v9, %v205_v9  ;;  %v226_v14 = vmul.f32 %v206_v10, %v206_v10  ;;  %v208_v21 = vld [vmem:[%s194_s8 + $0x18] sm:$0xff] }
  0x13   : > { %v212_v16 = vadd.f32 %v211_v12, %v210_v11  ;;  %v213_v17 = vsel %vm209_vm0, %v207_v15, 0.0  ;;  %v227_v18 = vmul.f32 %v207_v15, %v207_v15  ;;  %v215_v24 = vsel %vm209_vm0, %v208_v21, 0.0 }
  0x14   : > { %305 = vperm.xlu1 %480, %v287_v7   ;;  %300 = vperm.xlu0 %479, %v286_v8   ;;  %v229_v19 = vsel %vm209_vm0, %v225_v13, 0.0  ;;  %v230_v20 = vsel %vm209_vm0, %v226_v14, 0.0  ;;  %v228_v25 = vmul.f32 %v208_v21, %v208_v21 }
  0x15   : > { %v214_v22 = vadd.f32 %v213_v17, %v212_v16  ;;  %v231_v23 = vadd.f32 %v230_v20, %v229_v19  ;;  %v232_v26 = vsel %vm209_vm0, %v227_v18, 0.0 }
  0x16   : > { %v234_v29 = vsel %vm209_vm0, %v228_v25, 0.0 }
  0x17   : > { %v216_v27 = vadd.f32 %v215_v24, %v214_v22  ;;  %v233_v28 = vadd.f32 %v232_v26, %v231_v23 }
  0x19   : > { %v217_v30 = vrot.slane %v216_v27, 4  ;;  %v235_v31 = vadd.f32 %v234_v29, %v233_v28 }
  0x1b   : > { %v218_v32 = vadd.f32 %v217_v30, %v216_v27  ;;  %v236_v33 = vrot.slane %v235_v31, 4 }
  0x1d   : > { %v219_v34 = vrot.slane %v218_v32, 2  ;;  %v237_v35 = vadd.f32 %v236_v33, %v235_v31 }
  0x1f   : > { %v220_v36 = vadd.f32 %v219_v34, %v218_v32  ;;  %v238_v37 = vrot.slane %v237_v35, 2 }
  0x21   : > { %v221_v38 = vrot.slane %v220_v36, 1  ;;  %v239_v39 = vadd.f32 %v238_v37, %v237_v35 }
  0x23   : > { %v222_v40 = vadd.f32 %v221_v38, %v220_v36  ;;  %v240_v41 = vrot.slane %v239_v39, 1 }
  0x25   : > { %v224_v42 = vmul.f32 0.03125, %v222_v40  ;;  %v241_v43 = vadd.f32 %v240_v41, %v239_v39 }
  0x27   : > { %v242_v44 = vmul.f32 0.03125, %v241_v43  ;;  %v243_v45 = vmul.f32 %v224_v42, %v224_v42  ;;  %v248_v49 = vsub.f32 %v205_v9, %v224_v42  ;;  %v249_v52 = vsub.f32 %v206_v10, %v224_v42 }
  0x28   : > { %v250_v57 = vsub.f32 %v207_v15, %v224_v42  ;;  %v251_v63 = vsub.f32 %v208_v21, %v224_v42 }
  0x29   : > { %v244_v46 = vsub.f32 %v242_v44, %v243_v45 }
  0x2b   : > { %v245_v47 = vmax.f32 %v244_v46, 0.0 }
  0x2d   : > { %v246_v48 = vadd.f32 1e-05, %v245_v47 }
  0x2f   : > { %481 = vrsqrt.f32 %v246_v48 }
  0x39   : > { %v482_v50 = vpop.eup %481 }
  0x3a   : > { %v252_v51 = vmul.f32 %v482_v50, %v248_v49  ;;  %v253_v58 = vmul.f32 %v482_v50, %v249_v52  ;;  %v254_v61 = vmul.f32 %v482_v50, %v250_v57  ;;  %v255_v4 = vmul.f32 %v482_v50, %v251_v63 }
  0x87   : > { %v291_v53 = vpop.permute.xlu1 %290  ;;  %v263_v54 = vpop.permute.xlu0 %262 }
  0x88   : > { %v280_v55 = vmul.f32 %v263_v54, %v252_v51 }
  0x8a   : > { %v308_v56 = vadd.f32 %v291_v53, %v280_v55 }
  0x8b   : > { %v273_v59 = vpop.permute.xlu1 %272  ;;  %v268_v60 = vpop.permute.xlu0 %267 }
  0x8c   : > { %312 = vxpose.xlu0.b32.start [1/4] (short) (narrow) %v308_v56, 64  ;;  %v281_v62 = vmul.f32 %v268_v60, %v253_v58  ;;  %v282_v3 = vmul.f32 %v273_v59, %v254_v61 }
  0x8f   : > { %v278_v0 = vpop.permute.xlu1 %277  ;;  %v296_v1 = vpop.permute.xlu0 %295 }
  0x90   : > { %v309_v2 = vadd.f32 %v296_v1, %v281_v62  ;;  %v283_v8 = vmul.f32 %v278_v0, %v255_v4 }
  0x92   : > { %313 = vxpose.xlu0.b32.cont [2/4] (short) (narrow) %v309_v2, 64 }
  0x93   : > { %v301_v5 = vpop.permute.xlu0 %300  ;;  %v306_v7 = vpop.permute.xlu1 %305 }
  0x94   : > { %v310_v6 = vadd.f32 %v301_v5, %v282_v3  ;;  %v311_v9 = vadd.f32 %v306_v7, %v283_v8 }
  0x96   : > { %314 = vxpose.xlu0.b32.cont [3/4] (short) (narrow) %v310_v6, 64 }
  0x9a   : > { %315 = vxpose.xlu0.b32.end [4/4] (short) (narrow) %v311_v9, 64 }
 0x10e   : > { %v328_v10 = vpop.trf.xlu0 }
 0x10f   : > { %345 = vst.msk [vmem:[%s203_s16] sm:$0xff] %vm344_vm1, %v328_v10 }
 0x112   : > { %v329_v11 = vpop.trf.xlu0 }
 0x113   : > { %346 = vst.msk [vmem:[%s203_s16 + $0x8] sm:$0xff] %vm344_vm1, %v329_v11 }
 0x116   : > { %v330_v12 = vpop.trf.xlu0 }
 0x117   : > { %347 = vst.msk [vmem:[%s203_s16 + $0x10] sm:$0xff] %vm344_vm1, %v330_v12 }
 0x11a   : > { %v331_v13 = vpop.trf.xlu0 }
 0x11b   : > { %348 = vst.msk [vmem:[%s203_s16 + $0x18] sm:$0xff] %vm344_vm1, %v331_v13 }
 0x11e   : > { %v332_v14 = vpop.trf.xlu0 }
 0x11f   : > { %349 = vst.msk [vmem:[%s203_s16 + $0x20] sm:$0xff] %vm344_vm1, %v332_v14 }
 0x122   : > { %v333_v15 = vpop.trf.xlu0 }
 0x123   : > { %350 = vst.msk [vmem:[%s203_s16 + $0x28] sm:$0xff] %vm344_vm1, %v333_v15 }
 0x126   : > { %v334_v16 = vpop.trf.xlu0 }
 0x127   : > { %351 = vst.msk [vmem:[%s203_s16 + $0x30] sm:$0xff] %vm344_vm1, %v334_v16 }
 0x12a   : > { %v335_v17 = vpop.trf.xlu0 }
 0x12b   : > { %352 = vst.msk [vmem:[%s203_s16 + $0x38] sm:$0xff] %vm344_vm1, %v335_v17 }
 0x12c PF: > { %s13_s14 = sadd.s32 1, %s505_s14   ;;  %s613_s12 = smov %s501_s13 }
 0x12d   : > { %p10_p5 = scmp.ge.s32.totalorder %s13_s14, 4   ;;  %s614_s13 = smov %s616_s15 }
 0x12f   :  { %12 = sbr.rel (!%p10_p5) target bundleno = 2 (0x2), region = 62 }

</bundles_post_ra>
